<compile_context>
chip_gen: v6e
topology: v6e:2x2x1
jax: 0.10.0
libtpu: 0.0.40
codegen_flags: <defaults>
</compile_context>

<pallas_src>
import jax
import jax.numpy as jnp
from jax.experimental import pallas as pl
from jax.experimental.pallas import tpu as pltpu

SUBLANE = 8  # batch-dim (sublane) padding quantum


def _round_up(x, m):
    return ((x + m - 1) // m) * m


def _choose_block_m(B, block_m):
    """Pick a batch tile (multiple of 8) so tiles divide B nearly evenly and,
    when B is large enough, there are >= 2 tiles for v7x's two TensorCores."""
    n_tiles = max(1, pl.cdiv(B, block_m))
    if n_tiles == 1 and B > SUBLANE:
        n_tiles = 2
    tm = _round_up(pl.cdiv(B, n_tiles), SUBLANE)
    return max(tm, SUBLANE)


def prepare_mlp_params(w1, b1, w2, b2, *, compute_dtype=jnp.bfloat16):
    """One-time prep of PyTorch-layout Linear params for the Pallas kernel.

    w1: (H, D_in), b1: (H,), w2: (O, H), b2: (O,)  [nn.Linear layout]
    Returns (w1_t (D,H), b1 (1,H) f32, w2_t (H,O), b2 (1,O) f32) with weights
    pre-transposed and cast to the MXU compute dtype exactly once.
    """
    w1_t = jnp.asarray(w1).T.astype(compute_dtype)          # (D_in, H)
    w2_t = jnp.asarray(w2).T.astype(compute_dtype)          # (H, O)
    b1_2d = jnp.asarray(b1, dtype=jnp.float32).reshape(1, -1)
    b2_2d = jnp.asarray(b2, dtype=jnp.float32).reshape(1, -1)
    return w1_t, b1_2d, w2_t, b2_2d


def mlp_kernel(x_ref, w1_ref, b1_ref, w2_ref, b2_ref, o_ref):
    # x_ref : (tm, D)  batch tile, MXU compute dtype (bf16 or f32)
    # w1_ref: (D, H)   pre-transposed, resident in VMEM
    # b1_ref: (1, H)   f32, resident
    # w2_ref: (H, O)   pre-transposed, resident
    # b2_ref: (1, O)   f32, resident
    x = x_ref[...]

    # Hidden layer on the MXU, f32 accumulate; bias + ReLU in f32 on the VPU.
    h = jnp.dot(x, w1_ref[...], preferred_element_type=jnp.float32)   # (tm, H)
    h = jnp.maximum(h + b1_ref[...], 0.0)

    # Output layer: cast h to the MXU compute dtype, accumulate in f32.
    h = h.astype(w2_ref.dtype)
    o = jnp.dot(h, w2_ref[...], preferred_element_type=jnp.float32)   # (tm, O)
    o_ref[...] = (o + b2_ref[...]).astype(o_ref.dtype)


def _mlp_call(x_p, w1_t, b1_2d, w2_t, b2_2d, *, tm, grid_m, out_dtype,
              single_buffer_resident):
    B_p, D = x_p.shape
    H = w1_t.shape[1]
    O = w2_t.shape[1]

    if single_buffer_resident:
        def resident(shape):
            # Constant index_map -> fetched once; single buffer halves the
            # resident-weight VMEM footprint (matters most on v7x / v5e).
            return pl.BlockSpec(shape, lambda i: (0, 0),
                                pipeline_mode=pl.Buffered(1))
    else:
        def resident(shape):
            return pl.BlockSpec(shape, lambda i: (0, 0))

    itemsize = x_p.dtype.itemsize
    cost = pl.CostEstimate(
        flops=2 * B_p * (D * H + H * O),
        transcendentals=0,
        bytes_accessed=(B_p * D * itemsize
                        + (D * H + H * O) * itemsize
                        + (H + O) * 4
                        + B_p * O * jnp.dtype(out_dtype).itemsize),
    )

    return pl.pallas_call(
        mlp_kernel,
        out_shape=jax.ShapeDtypeStruct((B_p, O), out_dtype),
        grid=(grid_m,),
        in_specs=[
            pl.BlockSpec((tm, D), lambda i: (i, 0)),   # x tiles stream per step
            resident((D, H)),                          # w1 resident in VMEM
            resident((1, H)),                          # b1 resident
            resident((H, O)),                          # w2 resident
            resident((1, O)),                          # b2 resident
        ],
        out_specs=pl.BlockSpec((tm, O), lambda i: (i, 0)),
        compiler_params=pltpu.CompilerParams(
            # Independent batch tiles: shard across v7x's 2 TensorCores;
            # harmless on single-TC v5e/v6e.
            dimension_semantics=("parallel",),
        ),
        cost_estimate=cost,
    )(x_p, w1_t, b1_2d, w2_t, b2_2d)


def mlp_forward(x, params, *, block_m=512):
    """x: [B, D_in]; params = prepare_mlp_params(...). Returns [B, O] in x.dtype."""
    w1_t, b1_2d, w2_t, b2_2d = params
    B, D = x.shape
    assert w1_t.shape[0] == D

    tm = _choose_block_m(B, block_m)
    B_p = _round_up(B, tm)
    grid_m = B_p // tm

    # Only x is touched per call: pad the batch to the tile grid and cast to
    # the (one-time prepared) MXU compute dtype.
    x_p = jnp.pad(x, ((0, B_p - B), (0, 0))).astype(w1_t.dtype)

    try:
        out_p = _mlp_call(x_p, w1_t, b1_2d, w2_t, b2_2d, tm=tm, grid_m=grid_m,
                          out_dtype=x.dtype, single_buffer_resident=True)
    except Exception:
        # Older JAX without pipeline_mode on pallas_call block specs: fall
        # back to default double-buffering (identical numerics).
        out_p = _mlp_call(x_p, w1_t, b1_2d, w2_t, b2_2d, tm=tm, grid_m=grid_m,
                          out_dtype=x.dtype, single_buffer_resident=False)

    return out_p[:B]


if __name__ == "__main__":
    # Small shapes consistent with the module: MLP(input_dim=16, hidden_dim=32, output_dim=16)
    B, D_in, H, O = 8, 16, 32, 16

    key = jax.random.PRNGKey(0)
    kx, kw1, kb1, kw2, kb2 = jax.random.split(key, 5)

    x = jax.random.normal(kx, (B, D_in), dtype=jnp.float32)
    # PyTorch Linear shapes: weight (out, in), bias (out,).
    w1 = jax.random.normal(kw1, (H, D_in), dtype=jnp.float32) * 0.1
    b1 = jax.random.normal(kb1, (H,), dtype=jnp.float32) * 0.1
    w2 = jax.random.normal(kw2, (O, H), dtype=jnp.float32) * 0.1
    b2 = jax.random.normal(kb2, (O,), dtype=jnp.float32) * 0.1

    # Reference in plain JAX (same semantics as the PyTorch forward).
    ref = jnp.maximum(x @ w1.T + b1, 0.0) @ w2.T + b2

    # bf16 MXU-operand path (the recommended throughput path on v5e/v6e/v7x).
    params_bf16 = prepare_mlp_params(w1, b1, w2, b2, compute_dtype=jnp.bfloat16)
    out_bf16 = mlp_forward(x, params_bf16)
    jax.block_until_ready(out_bf16)
    assert out_bf16.shape == (B, O)
    assert jnp.allclose(out_bf16, ref, atol=5e-2, rtol=5e-2), (
        f"bf16 path max abs err = {jnp.max(jnp.abs(out_bf16 - ref))}")

    # f32 path: exactness sanity check of the kernel structure.
    params_f32 = prepare_mlp_params(w1, b1, w2, b2, compute_dtype=jnp.float32)
    out_f32 = mlp_forward(x, params_f32)
    jax.block_until_ready(out_f32)
    assert out_f32.shape == (B, O)
    assert jnp.allclose(out_f32, ref, atol=1e-4, rtol=1e-4), (
        f"f32 path max abs err = {jnp.max(jnp.abs(out_f32 - ref))}")

    print("KERNEL_OK")
</pallas_src>

<mosaic_0001>
module attributes {stable_mosaic.version = 11 : i64} {
  func.func @mlp_kernel(%arg0: i32, %arg1: memref<8x16xbf16, #tpu.memory_space<vmem>>, %arg2: memref<16x32xbf16, #tpu.memory_space<vmem>>, %arg3: memref<1x32xf32, #tpu.memory_space<vmem>>, %arg4: memref<32x16xbf16, #tpu.memory_space<vmem>>, %arg5: memref<1x16xf32, #tpu.memory_space<vmem>>, %arg6: memref<8x16xf32, #tpu.memory_space<vmem>>) attributes {dimension_semantics = [#tpu.dimension_semantics<parallel>], iteration_bounds = array<i64: 1>, scalar_prefetch = 0 : i64, scratch_operands = 0 : i64, tpu.core_type = #tpu.core_type<tc>, window_params = [{transform_indices = @transform_0, window_bounds = array<i64: 8, 16>}, {pipeline_mode = #tpu.pipeline_mode<synchronous>, transform_indices = @transform_1, window_bounds = array<i64: 16, 32>}, {pipeline_mode = #tpu.pipeline_mode<synchronous>, transform_indices = @transform_2, window_bounds = array<i64: 1, 32>}, {pipeline_mode = #tpu.pipeline_mode<synchronous>, transform_indices = @transform_3, window_bounds = array<i64: 32, 16>}, {pipeline_mode = #tpu.pipeline_mode<synchronous>, transform_indices = @transform_4, window_bounds = array<i64: 1, 16>}, {transform_indices = @transform_5, window_bounds = array<i64: 8, 16>}]} {
    %c0 = arith.constant 0 : index
    %c0_0 = arith.constant 0 : index
    %0 = vector.load %arg1[%c0, %c0_0] : memref<8x16xbf16, #tpu.memory_space<vmem>>, vector<8x16xbf16>
    %c0_1 = arith.constant 0 : index
    %c0_2 = arith.constant 0 : index
    %1 = vector.load %arg2[%c0_1, %c0_2] : memref<16x32xbf16, #tpu.memory_space<vmem>>, vector<16x32xbf16>
    %cst = arith.constant dense<0.000000e+00> : vector<8x32xf32>
    %2 = tpu.matmul %0, %1, %cst {dimension_numbers = #tpu.dot_dimension_numbers<[1], [0], [0], [1], [0, 0, 1, 1], [], []>} : vector<8x16xbf16>, vector<16x32xbf16>, vector<8x32xf32> -> vector<8x32xf32>
    %c0_3 = arith.constant 0 : index
    %c0_4 = arith.constant 0 : index
    %3 = vector.load %arg3[%c0_3, %c0_4] : memref<1x32xf32, #tpu.memory_space<vmem>>, vector<1x32xf32>
    %4 = vector.broadcast %3 : vector<1x32xf32> to vector<8x32xf32>
    %5 = arith.addf %2, %4 : vector<8x32xf32>
    %cst_5 = arith.constant 0.000000e+00 : f32
    %6 = vector.broadcast %cst_5 : f32 to vector<8x32xf32>
    %7 = arith.maximumf %5, %6 : vector<8x32xf32>
    %8 = arith.truncf %7 : vector<8x32xf32> to vector<8x32xbf16>
    %c0_6 = arith.constant 0 : index
    %c0_7 = arith.constant 0 : index
    %9 = vector.load %arg4[%c0_6, %c0_7] : memref<32x16xbf16, #tpu.memory_space<vmem>>, vector<32x16xbf16>
    %cst_8 = arith.constant dense<0.000000e+00> : vector<8x16xf32>
    %10 = tpu.matmul %8, %9, %cst_8 {dimension_numbers = #tpu.dot_dimension_numbers<[1], [0], [0], [1], [0, 0, 1, 1], [], []>} : vector<8x32xbf16>, vector<32x16xbf16>, vector<8x16xf32> -> vector<8x16xf32>
    %c0_9 = arith.constant 0 : index
    %c0_10 = arith.constant 0 : index
    %11 = vector.load %arg5[%c0_9, %c0_10] : memref<1x16xf32, #tpu.memory_space<vmem>>, vector<1x16xf32>
    %12 = vector.broadcast %11 : vector<1x16xf32> to vector<8x16xf32>
    %13 = arith.addf %10, %12 : vector<8x16xf32>
    %c0_11 = arith.constant 0 : index
    %c0_12 = arith.constant 0 : index
    %14 = vector.load %arg6[%c0_11, %c0_12] : memref<8x16xf32, #tpu.memory_space<vmem>>, vector<8x16xf32>
    tpu.vector_store %arg6[%c0_11, %c0_12], %13 {strides = array<i32>} : memref<8x16xf32, #tpu.memory_space<vmem>>, vector<8x16xf32>,
    return
  }
  func.func @transform_0(%arg0: i32) -> (i32, i32) {
    %c0_i32 = arith.constant 0 : i32
    %c0_i32_0 = arith.constant 0 : i32
    return %arg0, %c0_i32 : i32, i32
  }
  func.func @transform_1(%arg0: i32) -> (i32, i32) {
    %c0_i32 = arith.constant 0 : i32
    %c0_i32_0 = arith.constant 0 : i32
    %c0_i32_1 = arith.constant 0 : i32
    return %c0_i32, %c0_i32_0 : i32, i32
  }
  func.func @transform_2(%arg0: i32) -> (i32, i32) {
    %c0_i32 = arith.constant 0 : i32
    %c0_i32_0 = arith.constant 0 : i32
    %c0_i32_1 = arith.constant 0 : i32
    return %c0_i32, %c0_i32_0 : i32, i32
  }
  func.func @transform_3(%arg0: i32) -> (i32, i32) {
    %c0_i32 = arith.constant 0 : i32
    %c0_i32_0 = arith.constant 0 : i32
    %c0_i32_1 = arith.constant 0 : i32
    return %c0_i32, %c0_i32_0 : i32, i32
  }
  func.func @transform_4(%arg0: i32) -> (i32, i32) {
    %c0_i32 = arith.constant 0 : i32
    %c0_i32_0 = arith.constant 0 : i32
    %c0_i32_1 = arith.constant 0 : i32
    return %c0_i32, %c0_i32_0 : i32, i32
  }
  func.func @transform_5(%arg0: i32) -> (i32, i32) {
    %c0_i32 = arith.constant 0 : i32
    %c0_i32_0 = arith.constant 0 : i32
    return %arg0, %c0_i32 : i32, i32
  }
}

module attributes {stable_mosaic.version = 11 : i64} {
  func.func @mlp_kernel(%arg0: i32, %arg1: memref<8x16xbf16, #tpu.memory_space<vmem>>, %arg2: memref<16x32xbf16, #tpu.memory_space<vmem>>, %arg3: memref<1x32xf32, #tpu.memory_space<vmem>>, %arg4: memref<32x16xbf16, #tpu.memory_space<vmem>>, %arg5: memref<1x16xf32, #tpu.memory_space<vmem>>, %arg6: memref<8x16xf32, #tpu.memory_space<vmem>>) attributes {dimension_semantics = [#tpu.dimension_semantics<parallel>], iteration_bounds = array<i64: 1>, scalar_prefetch = 0 : i64, scratch_operands = 0 : i64, tpu.core_type = #tpu.core_type<tc>, window_params = [{transform_indices = @transform_0, window_bounds = array<i64: 8, 16>}, {pipeline_mode = #tpu.pipeline_mode<synchronous>, transform_indices = @transform_1, window_bounds = array<i64: 16, 32>}, {pipeline_mode = #tpu.pipeline_mode<synchronous>, transform_indices = @transform_2, window_bounds = array<i64: 1, 32>}, {pipeline_mode = #tpu.pipeline_mode<synchronous>, transform_indices = @transform_3, window_bounds = array<i64: 32, 16>}, {pipeline_mode = #tpu.pipeline_mode<synchronous>, transform_indices = @transform_4, window_bounds = array<i64: 1, 16>}, {transform_indices = @transform_5, window_bounds = array<i64: 8, 16>}]} {
    %c0 = arith.constant 0 : index
    %c0_0 = arith.constant 0 : index
    %0 = vector.load %arg1[%c0, %c0_0] : memref<8x16xbf16, #tpu.memory_space<vmem>>, vector<8x16xbf16>
    %c0_1 = arith.constant 0 : index
    %c0_2 = arith.constant 0 : index
    %1 = vector.load %arg2[%c0_1, %c0_2] : memref<16x32xbf16, #tpu.memory_space<vmem>>, vector<16x32xbf16>
    %cst = arith.constant dense<0.000000e+00> : vector<8x32xf32>
    %2 = tpu.matmul %0, %1, %cst {dimension_numbers = #tpu.dot_dimension_numbers<[1], [0], [0], [1], [0, 0, 1, 1], [], []>} : vector<8x16xbf16>, vector<16x32xbf16>, vector<8x32xf32> -> vector<8x32xf32>
    %c0_3 = arith.constant 0 : index
    %c0_4 = arith.constant 0 : index
    %3 = vector.load %arg3[%c0_3, %c0_4] : memref<1x32xf32, #tpu.memory_space<vmem>>, vector<1x32xf32>
    %4 = vector.broadcast %3 : vector<1x32xf32> to vector<8x32xf32>
    %5 = arith.addf %2, %4 : vector<8x32xf32>
    %cst_5 = arith.constant 0.000000e+00 : f32
    %6 = vector.broadcast %cst_5 : f32 to vector<8x32xf32>
    %7 = arith.maximumf %5, %6 : vector<8x32xf32>
    %8 = arith.truncf %7 : vector<8x32xf32> to vector<8x32xbf16>
    %c0_6 = arith.constant 0 : index
    %c0_7 = arith.constant 0 : index
    %9 = vector.load %arg4[%c0_6, %c0_7] : memref<32x16xbf16, #tpu.memory_space<vmem>>, vector<32x16xbf16>
    %cst_8 = arith.constant dense<0.000000e+00> : vector<8x16xf32>
    %10 = tpu.matmul %8, %9, %cst_8 {dimension_numbers = #tpu.dot_dimension_numbers<[1], [0], [0], [1], [0, 0, 1, 1], [], []>} : vector<8x32xbf16>, vector<32x16xbf16>, vector<8x16xf32> -> vector<8x16xf32>
    %c0_9 = arith.constant 0 : index
    %c0_10 = arith.constant 0 : index
    %11 = vector.load %arg5[%c0_9, %c0_10] : memref<1x16xf32, #tpu.memory_space<vmem>>, vector<1x16xf32>
    %12 = vector.broadcast %11 : vector<1x16xf32> to vector<8x16xf32>
    %13 = arith.addf %10, %12 : vector<8x16xf32>
    %c0_11 = arith.constant 0 : index
    %c0_12 = arith.constant 0 : index
    %14 = vector.load %arg6[%c0_11, %c0_12] : memref<8x16xf32, #tpu.memory_space<vmem>>, vector<8x16xf32>
    tpu.vector_store %arg6[%c0_11, %c0_12], %13 {strides = array<i32>} : memref<8x16xf32, #tpu.memory_space<vmem>>, vector<8x16xf32>,
    return
  }
  func.func @transform_0(%arg0: i32) -> (i32, i32) {
    %c0_i32 = arith.constant 0 : i32
    %c0_i32_0 = arith.constant 0 : i32
    return %arg0, %c0_i32 : i32, i32
  }
  func.func @transform_1(%arg0: i32) -> (i32, i32) {
    %c0_i32 = arith.constant 0 : i32
    %c0_i32_0 = arith.constant 0 : i32
    %c0_i32_1 = arith.constant 0 : i32
    return %c0_i32, %c0_i32_0 : i32, i32
  }
  func.func @transform_2(%arg0: i32) -> (i32, i32) {
    %c0_i32 = arith.constant 0 : i32
    %c0_i32_0 = arith.constant 0 : i32
    %c0_i32_1 = arith.constant 0 : i32
    return %c0_i32, %c0_i32_0 : i32, i32
  }
  func.func @transform_3(%arg0: i32) -> (i32, i32) {
    %c0_i32 = arith.constant 0 : i32
    %c0_i32_0 = arith.constant 0 : i32
    %c0_i32_1 = arith.constant 0 : i32
    return %c0_i32, %c0_i32_0 : i32, i32
  }
  func.func @transform_4(%arg0: i32) -> (i32, i32) {
    %c0_i32 = arith.constant 0 : i32
    %c0_i32_0 = arith.constant 0 : i32
    %c0_i32_1 = arith.constant 0 : i32
    return %c0_i32, %c0_i32_0 : i32, i32
  }
  func.func @transform_5(%arg0: i32) -> (i32, i32) {
    %c0_i32 = arith.constant 0 : i32
    %c0_i32_0 = arith.constant 0 : i32
    return %arg0, %c0_i32 : i32, i32
  }
}

</mosaic_0001>

<bundles_post_ra>
// kernel: tpu_custom_call.1
= control target key start
LH: loop header
LB: loop body
LE: loop exit
PB: predicated region body
PF: predicated region fallthrough
CT: control target
= control target key end

     0   :  { %v220_v1 = vmov 0.0   ;;  %vm38_vm0 = vcmask 130048   ;;  %vm221_vm1 = vmmov 0   ;;  %s276_s0 = inlined_call_operand.vmem [shape: bf16[8,16], index: 0, kind: input, shape index: {}]   ;;  %s277_s1 = inlined_call_operand.vmem [shape: bf16[16,32], index: 1, kind: input, shape index: {}]   ;;  %s278_s2 = inlined_call_operand.vmem [shape: f32[1,32], index: 2, kind: input, shape index: {}]   ;;  %s279_s3 = inlined_call_operand.vmem [shape: bf16[32,16], index: 3, kind: input, shape index: {}]   ;;  %s280_s4 = inlined_call_operand.vmem [shape: f32[1,16], index: 4, kind: input, shape index: {}]   ;;  %s281_s5 = inlined_call_operand.hbm [shape: f32[8,16], index: 5, kind: output, shape index: {}]  }
   0x1   :  { %v195_v0 = vld [vmem:[%s277_s1] sm:$0xff]   ;;  %178 = vmatprep.subr.bf16.mxu0 %v220_v1  ;;  %184 = vmatprep.subr.bf16.mxu1 %v220_v1 }
   0x2   :  { %v22_v2 = vld [vmem:[%s276_s0] sm:$0xf]  ;;  %179 = vmatpush3.bf16.msra.mxu0 %v195_v0  ;;  %180 = vmatprep.mubr.msk.bf16.mxu0 %vm221_vm1, %v220_v1 }
   0x3   :  { %188 = vmatprep.mubr.msk.bf16.mxu1 %vm221_vm1, %v220_v1 }
   0x4   :  { %10 = vsyncpa [#allocation3], 0  ;;  %v196_v3 = vld [vmem:[%s279_s3 + $0x8] sm:$0xff]   ;;  %v197_v4 = vld [vmem:[%s279_s3] sm:$0xff]   ;;  %vm107_vm2 = vcmask 261120   ;;  %s222_s28 = smov [#allocation2]  }
   0x5   :  { %181 = vmatmul.mubr.msk.bf16.vlgmr.msra.gmra.mxu0 %vm38_vm0, %v22_v2  ;;  %185 = vmatpush3.bf16.msra.mxu1 %v196_v3  ;;  %v166_v5 = vld [vmem:[%s278_s2] ss:$0 sm:$0xff]  ;;  %s158_s3 = sshll.u32 %s222_s28, 4  ;;  %s159_s3 = int_to_ptr.vmem [resolvable:$true] %s158_s3 }
   0x6   :  { %186 = vmatprep.subr.bf16.mxu1 %v220_v1  ;;  %v169_v13 = vld [vmem:[%s280_s4] ss:$0 sm:$0xff]  ;;  %s198_s2 = scalar_lea.vmem %s159_s3, 128  ;;  %p203_p1 = scmp.lt.s32.totalorder %s159_s3, %s159_s3 }
   0x7   :  { %p199_p0 = scmp.ne.s32.totalorder %s159_s3, %s198_s2  ;;  %p204_p2 = scmp.lt.s32.totalorder %s198_s2, %s198_s2 }
   0x9   :  { %187 = vmatpush3.bf16.msra.mxu1 %v197_v4  ;;  %p205_p3 = por %p204_p2, %p203_p1 }
   0xb   :  { %p206_p4 = pnand %p205_p3, %p199_p0 }
  0xc5   :  { %v76_v6 = vpop.f32.mrf.mxu0 }
  0xc6   :  { %v77_v7 = vadd.f32 %v166_v5, %v76_v6 }
  0xc7   :  { %v182_v8 = vpop.f32.mrf.mxu0 }
  0xc8   :  { %v82_v9 = vmax.f32 %v77_v7, 0.0 }
  0xc9   :  { %v79_v10 = vpop.f32.mrf.mxu0 }
  0xca   :  { %v83_v11 = vpack.c.bf16 %v82_v9, %v82_v9 }
  0xcb   :  { %v183_v12 = vpop.f32.mrf.mxu0 }
  0xcc   :  { %189 = vmatmul.mubr.msk.bf16.vlgmr.msra.gmra.mxu1 %vm107_vm2, %v83_v11 }
 0x18c   :  { %v145_v14 = vpop.f32.mrf.mxu1 }
 0x18d   :  { %v146_v15 = vadd.f32 %v169_v13, %v145_v14 }
 0x18e   :  { %v190_v16 = vpop.f32.mrf.mxu1 }
 0x18f   :  { %151 = vst.msk [vmem:[#allocation2] sm:$0xff] %vm38_vm0, %v146_v15 }
 0x190   :  { %v148_v17 = vpop.f32.mrf.mxu1 }
 0x191   :  { %209 = shalt.err (!%p206_p4)
}
 0x192   :  { %161 = dma.vmem_to_hbm [thread:$0]  %s159_s3, 128, %s281_s5, [#allocation3]   ;;  %v191_v18 = vpop.f32.mrf.mxu1 }
 0x193   :  { %218 = dma.done.wait [#allocation3], 128  }
 0x194   :  { %219 = vsyncadd [#allocation3], 4294967168 }
 0x195   :  { %165 = vsyncpa [#allocation3], 1 }

// kernel: tpu_custom_call.1
= control target key start
LH: loop header
LB: loop body
LE: loop exit
PB: predicated region body
PF: predicated region fallthrough
CT: control target
= control target key end

     0   :  { %v220_v1 = vmov 0.0   ;;  %vm38_vm0 = vcmask 130048   ;;  %vm221_vm1 = vmmov 0   ;;  %s276_s0 = inlined_call_operand.vmem [shape: bf16[8,16], index: 0, kind: input, shape index: {}]   ;;  %s277_s1 = inlined_call_operand.vmem [shape: bf16[16,32], index: 1, kind: input, shape index: {}]   ;;  %s278_s2 = inlined_call_operand.vmem [shape: f32[1,32], index: 2, kind: input, shape index: {}]   ;;  %s279_s3 = inlined_call_operand.vmem [shape: bf16[32,16], index: 3, kind: input, shape index: {}]   ;;  %s280_s4 = inlined_call_operand.vmem [shape: f32[1,16], index: 4, kind: input, shape index: {}]   ;;  %s281_s5 = inlined_call_operand.hbm [shape: f32[8,16], index: 5, kind: output, shape index: {}]  }
   0x1   :  { %v195_v0 = vld [vmem:[%s277_s1] sm:$0xff]   ;;  %178 = vmatprep.subr.bf16.mxu0 %v220_v1  ;;  %184 = vmatprep.subr.bf16.mxu1 %v220_v1 }
   0x2   :  { %v22_v2 = vld [vmem:[%s276_s0] sm:$0xf]  ;;  %179 = vmatpush3.bf16.msra.mxu0 %v195_v0  ;;  %180 = vmatprep.mubr.msk.bf16.mxu0 %vm221_vm1, %v220_v1 }
   0x3   :  { %188 = vmatprep.mubr.msk.bf16.mxu1 %vm221_vm1, %v220_v1 }
   0x4   :  { %10 = vsyncpa [#allocation3], 0  ;;  %v196_v3 = vld [vmem:[%s279_s3 + $0x8] sm:$0xff]   ;;  %v197_v4 = vld [vmem:[%s279_s3] sm:$0xff]   ;;  %vm107_vm2 = vcmask 261120   ;;  %s222_s28 = smov [#allocation2]  }
   0x5   :  { %181 = vmatmul.mubr.msk.bf16.vlgmr.msra.gmra.mxu0 %vm38_vm0, %v22_v2  ;;  %185 = vmatpush3.bf16.msra.mxu1 %v196_v3  ;;  %v166_v5 = vld [vmem:[%s278_s2] ss:$0 sm:$0xff]  ;;  %s158_s3 = sshll.u32 %s222_s28, 4  ;;  %s159_s3 = int_to_ptr.vmem [resolvable:$true] %s158_s3 }
   0x6   :  { %186 = vmatprep.subr.bf16.mxu1 %v220_v1  ;;  %v169_v13 = vld [vmem:[%s280_s4] ss:$0 sm:$0xff]  ;;  %s198_s2 = scalar_lea.vmem %s159_s3, 128  ;;  %p203_p1 = scmp.lt.s32.totalorder %s159_s3, %s159_s3 }
   0x7   :  { %p199_p0 = scmp.ne.s32.totalorder %s159_s3, %s198_s2  ;;  %p204_p2 = scmp.lt.s32.totalorder %s198_s2, %s198_s2 }
   0x9   :  { %187 = vmatpush3.bf16.msra.mxu1 %v197_v4  ;;  %p205_p3 = por %p204_p2, %p203_p1 }
   0xb   :  { %p206_p4 = pnand %p205_p3, %p199_p0 }
  0xc5   :  { %v76_v6 = vpop.f32.mrf.mxu0 }
  0xc6   :  { %v77_v7 = vadd.f32 %v166_v5, %v76_v6 }
  0xc7   :  { %v182_v8 = vpop.f32.mrf.mxu0 }
  0xc8   :  { %v82_v9 = vmax.f32 %v77_v7, 0.0 }
  0xc9   :  { %v79_v10 = vpop.f32.mrf.mxu0 }
  0xca   :  { %v83_v11 = vpack.c.bf16 %v82_v9, %v82_v9 }
  0xcb   :  { %v183_v12 = vpop.f32.mrf.mxu0 }
  0xcc   :  { %189 = vmatmul.mubr.msk.bf16.vlgmr.msra.gmra.mxu1 %vm107_vm2, %v83_v11 }
 0x18c   :  { %v145_v14 = vpop.f32.mrf.mxu1 }
 0x18d   :  { %v146_v15 = vadd.f32 %v169_v13, %v145_v14 }
 0x18e   :  { %v190_v16 = vpop.f32.mrf.mxu1 }
 0x18f   :  { %151 = vst.msk [vmem:[#allocation2] sm:$0xff] %vm38_vm0, %v146_v15 }
 0x190   :  { %v148_v17 = vpop.f32.mrf.mxu1 }
 0x191   :  { %209 = shalt.err (!%p206_p4)
}
 0x192   :  { %161 = dma.vmem_to_hbm [thread:$0]  %s159_s3, 128, %s281_s5, [#allocation3]   ;;  %v191_v18 = vpop.f32.mrf.mxu1 }
 0x193   :  { %218 = dma.done.wait [#allocation3], 128  }
 0x194   :  { %219 = vsyncadd [#allocation3], 4294967168 }
 0x195   :  { %165 = vsyncpa [#allocation3], 1 }

</bundles_post_ra>
